<compile_context>
chip_gen: v7x
topology: tpu7x:2x2x1
jax: 0.10.0
libtpu: 0.0.40
codegen_flags: <defaults>
</compile_context>

<pallas_src>
import math

import numpy as np
import jax
import jax.numpy as jnp
from jax.experimental import pallas as pl
from jax.experimental.pallas import tpu as pltpu


def get_mask(in_features, out_features, in_flow_features, mask_type=None):
    """JAX port of the PyTorch get_mask (returns (out_features, in_features))."""
    if mask_type == 'input':
        in_degrees = np.arange(in_features) % in_flow_features
    else:
        in_degrees = np.arange(in_features) % (in_flow_features - 1)
    if mask_type == 'output':
        out_degrees = np.arange(out_features) % in_flow_features - 1
    else:
        out_degrees = np.arange(out_features) % (in_flow_features - 1)
    return jnp.asarray(
        (out_degrees[:, None] >= in_degrees[None, :]).astype(np.float32))


def _made_direct_kernel(x_ref,
                        w1_ref, b1_ref,
                        w2_ref, b2_ref,
                        w3_ref, b3_ref,
                        u_ref, logdet_ref):
    """One batch tile.  Weights are pre-masked, transposed to (in, out), and in
    the MXU dtype (bf16 by default); biases are f32; accumulation is f32."""
    D = u_ref.shape[-1]
    mxu_dt = w1_ref.dtype

    x_in = x_ref[...]                       # (block_b, D) in x's HBM dtype
    x32 = x_in.astype(jnp.float32)          # f32 copy for the residual

    # joiner: (pre-masked) linear + relu
    h = jnp.dot(x_in.astype(mxu_dt), w1_ref[...],
                preferred_element_type=jnp.float32)
    h = jnp.maximum(h + b1_ref[...], 0.0)

    # trunk hidden: (pre-masked) linear + relu
    h = jnp.dot(h.astype(mxu_dt), w2_ref[...],
                preferred_element_type=jnp.float32)
    h = jnp.maximum(h + b2_ref[...], 0.0)

    # trunk output: single fused (H, 2D) MXU pass; split m / a in-register
    # (== torch .chunk(2, 1) on the un-transposed weight).
    out = jnp.dot(h.astype(mxu_dt), w3_ref[...],
                  preferred_element_type=jnp.float32) + b3_ref[...]
    m = out[:, :D]
    a = out[:, D:]

    u_ref[...] = ((x32 - m) * jnp.exp(-a)).astype(u_ref.dtype)
    # per-row log|det J| = -sum_d a_d  -> shape (block_b, 1)
    logdet_ref[...] = (-jnp.sum(a, axis=-1, keepdims=True)).astype(
        logdet_ref.dtype)


def _pick_block_b(B, itemsize):
    """Largest multiple-of-sublane divisor of B, capped at 1024, preferring
    >= 2 grid steps (v7x has 2 TensorCores; also enables DMA/compute overlap)."""
    base = 16 if itemsize < 4 else 8
    if B <= base or B % base != 0:
        return B                      # single full-batch tile (full-dim block is legal)
    target = min(1024, B // 2)
    target = max(base, (target // base) * base)
    cand = target
    while cand >= base:
        if B % cand == 0:
            return cand
        cand -= base
    return B


def _vmem_limit_bytes():
    """Generation-aware scoped VMEM limit."""
    try:
        cap = pltpu.get_tpu_info().vmem_capacity_bytes
    except Exception:
        cap = None
    if cap is not None and cap > 96 * 1024 * 1024:
        return 96 * 1024 * 1024       # v5e / v6e: 128 MiB physical VMEM
    return 32 * 1024 * 1024           # v7x (64 MiB physical) or unknown: conservative


def made_forward_direct(x, w1, b1, w2, b2, w3, b3,
                        input_mask, hidden_mask, output_mask,
                        *, block_b=None, mxu_dtype=jnp.bfloat16,
                        interpret=False):
    """MADE forward, mode='direct', cond_inputs=None.

    Args:
      x:           (B, D)          input dtype preserved on the HBM path
      w1, b1:      (H, D), (H,)    joiner MaskedLinear
      w2, b2:      (H, H), (H,)    trunk hidden MaskedLinear
      w3, b3:      (2D, H), (2D,)  trunk output MaskedLinear
      input_mask:  (H, D)
      hidden_mask: (H, H)
      output_mask: (2D, H)
    Returns:
      u:      (B, D)   same dtype as x
      logdet: (B, 1)   float32   (== -a.sum(-1, keepdim=True))
    """
    B, D = x.shape
    H = w1.shape[0]
    assert w1.shape == (H, D) and input_mask.shape == (H, D)
    assert w2.shape == (H, H) and hidden_mask.shape == (H, H)
    assert w3.shape == (2 * D, H) and output_mask.shape == (2 * D, H)

    # --- one-time parameter prep (tiny, parameter-shaped) --------------------
    #  1) pre-multiply weights by their constant masks (no per-step VPU work)
    #  2) transpose to (in, out) so the kernel contracts lhs-last x rhs-first
    #  3) keep the output layer as one (H, 2D) operand: cols [0:D)=m, [D:2D)=a
    #  4) cast weights to the MXU dtype (bf16 default) for native throughput
    f32 = jnp.float32
    w1m = (w1 * input_mask).T.astype(mxu_dtype)        # (D, H)
    w2m = (w2 * hidden_mask).T.astype(mxu_dtype)       # (H, H)
    w3m = (w3 * output_mask).T.astype(mxu_dtype)       # (H, 2D)
    b1r = b1.reshape(1, H).astype(f32)
    b2r = b2.reshape(1, H).astype(f32)
    b3r = b3.reshape(1, 2 * D).astype(f32)

    itemsize = jnp.dtype(x.dtype).itemsize
    base = 16 if itemsize < 4 else 8
    if block_b is None:
        block_b = _pick_block_b(B, itemsize)
    block_b = min(block_b, B)
    # Assert unconditionally (review correctness concern #3): either one full-
    # batch block, or a sublane-aligned tile that divides B exactly.
    assert block_b == B or (block_b % base == 0 and B % block_b == 0), (
        f"block_b={block_b} must equal B or be a multiple of {base} dividing B={B}")
    nb = B // block_b if block_b != B else 1

    x_spec = pl.BlockSpec((block_b, D), lambda i: (i, 0))
    out_specs = (
        pl.BlockSpec((block_b, D), lambda i: (i, 0)),   # u  (streamed)
        pl.BlockSpec((block_b, 1), lambda i: (i, 0)),   # logdet per row
    )
    param_shapes = [(D, H), (1, H), (H, H), (1, H), (H, 2 * D), (1, 2 * D)]

    param_bytes = ((D * H + H * H + H * 2 * D) * jnp.dtype(mxu_dtype).itemsize
                   + (H + H + 2 * D) * 4)
    cost = pl.CostEstimate(
        flops=2 * B * H * (3 * D + H),
        transcendentals=B * D,                       # exp(-a)
        bytes_accessed=2 * B * D * itemsize + 4 * B + param_bytes,
    )

    def build(single_buffer_params):
        if single_buffer_params:
            # Parameters never change across the batch grid: single-buffer them
            # so they are fetched once and don't pay 2x VMEM (matters on v7x).
            const = lambda s: pl.BlockSpec(s, lambda i: (0, 0),
                                           pipeline_mode=pl.Buffered(1))
        else:
            const = lambda s: pl.BlockSpec(s, lambda i: (0, 0))
        return pl.pallas_call(
            _made_direct_kernel,
            out_shape=(
                jax.ShapeDtypeStruct((B, D), x.dtype),       # u
                jax.ShapeDtypeStruct((B, 1), jnp.float32),   # logdet
            ),
            grid=(nb,),
            in_specs=[x_spec] + [const(s) for s in param_shapes],
            out_specs=out_specs,
            compiler_params=pltpu.CompilerParams(
                dimension_semantics=("parallel",),   # batch tiles independent
                vmem_limit_bytes=_vmem_limit_bytes(),
            ),
            cost_estimate=cost,
            interpret=interpret,
        )

    args = (x, w1m, b1r, w2m, b2r, w3m, b3r)
    try:
        u, logdet = build(True)(*args)
    except Exception:
        # pipeline_mode=pl.Buffered(1) not supported by this jax/libtpu build;
        # fall back to default double-buffered parameters (correctness identical,
        # only costs extra resident VMEM).
        u, logdet = build(False)(*args)
    return u, logdet


if __name__ == "__main__":
    # small demo shapes consistent with MADE: batch=64, num_inputs=16, hidden=64
    B, D, H = 64, 16, 64

    key = jax.random.PRNGKey(0)
    keys = jax.random.split(key, 4)
    x = jax.random.normal(keys[0], (B, D), dtype=jnp.float32)

    def init_linear(k, fan_in, fan_out):
        kw, kb = jax.random.split(k)
        bound = 1.0 / math.sqrt(fan_in)
        w = jax.random.uniform(kw, (fan_out, fan_in), dtype=jnp.float32,
                               minval=-bound, maxval=bound)
        b = jax.random.uniform(kb, (fan_out,), dtype=jnp.float32,
                               minval=-bound, maxval=bound)
        return w, b

    w1, b1 = init_linear(keys[1], D, H)          # joiner
    w2, b2 = init_linear(keys[2], H, H)          # trunk hidden
    w3, b3 = init_linear(keys[3], H, 2 * D)      # trunk output

    input_mask = get_mask(D, H, D, mask_type='input')
    hidden_mask = get_mask(H, H, D)
    output_mask = get_mask(H, 2 * D, D, mask_type='output')

    u, logdet = made_forward_direct(x, w1, b1, w2, b2, w3, b3,
                                    input_mask, hidden_mask, output_mask)
    jax.block_until_ready((u, logdet))

    # plain-JAX f32 reference (mirrors the PyTorch forward, mode='direct')
    def ref(xv):
        h = jnp.maximum(xv @ (w1 * input_mask).T + b1, 0.0)
        h = jnp.maximum(h @ (w2 * hidden_mask).T + b2, 0.0)
        out = h @ (w3 * output_mask).T + b3
        m, a = out[:, :D], out[:, D:]
        return (xv - m) * jnp.exp(-a), -jnp.sum(a, axis=-1, keepdims=True)

    u_ref, ld_ref = ref(x)
    assert u.shape == (B, D) and logdet.shape == (B, 1)
    # bf16 MXU operands cost ~3 decimal digits vs. the f32 reference; the sum
    # over D amplifies the logdet tolerance slightly (documented per review).
    assert jnp.allclose(u, u_ref, atol=2.5e-2, rtol=2.5e-2), (
        float(jnp.max(jnp.abs(u - u_ref))))
    assert jnp.allclose(logdet, ld_ref, atol=5e-2, rtol=3e-2), (
        float(jnp.max(jnp.abs(logdet - ld_ref))))

    print("KERNEL_OK")
</pallas_src>

<mosaic_0001>
module attributes {stable_mosaic.version = 11 : i64} {
  func.func @_made_direct_kernel(%arg0: i32, %arg1: memref<32x16xf32, #tpu.memory_space<vmem>>, %arg2: memref<16x64xbf16, #tpu.memory_space<vmem>>, %arg3: memref<1x64xf32, #tpu.memory_space<vmem>>, %arg4: memref<64x64xbf16, #tpu.memory_space<vmem>>, %arg5: memref<1x64xf32, #tpu.memory_space<vmem>>, %arg6: memref<64x32xbf16, #tpu.memory_space<vmem>>, %arg7: memref<1x32xf32, #tpu.memory_space<vmem>>, %arg8: memref<32x16xf32, #tpu.memory_space<vmem>>, %arg9: memref<32x1xf32, #tpu.memory_space<vmem>>) attributes {dimension_semantics = [#tpu.dimension_semantics<parallel>], iteration_bounds = array<i64: 2>, scalar_prefetch = 0 : i64, scratch_operands = 0 : i64, tpu.core_type = #tpu.core_type<tc>, window_params = [{transform_indices = @transform_0, window_bounds = array<i64: 32, 16>}, {pipeline_mode = #tpu.pipeline_mode<synchronous>, transform_indices = @transform_1, window_bounds = array<i64: 16, 64>}, {pipeline_mode = #tpu.pipeline_mode<synchronous>, transform_indices = @transform_2, window_bounds = array<i64: 1, 64>}, {pipeline_mode = #tpu.pipeline_mode<synchronous>, transform_indices = @transform_3, window_bounds = array<i64: 64, 64>}, {pipeline_mode = #tpu.pipeline_mode<synchronous>, transform_indices = @transform_4, window_bounds = array<i64: 1, 64>}, {pipeline_mode = #tpu.pipeline_mode<synchronous>, transform_indices = @transform_5, window_bounds = array<i64: 64, 32>}, {pipeline_mode = #tpu.pipeline_mode<synchronous>, transform_indices = @transform_6, window_bounds = array<i64: 1, 32>}, {transform_indices = @transform_7, window_bounds = array<i64: 32, 16>}, {transform_indices = @transform_8, window_bounds = array<i64: 32, 1>}]} {
    %c0 = arith.constant 0 : index
    %c0_0 = arith.constant 0 : index
    %0 = vector.load %arg1[%c0, %c0_0] : memref<32x16xf32, #tpu.memory_space<vmem>>, vector<32x16xf32>
    %1 = arith.truncf %0 : vector<32x16xf32> to vector<32x16xbf16>
    %c0_1 = arith.constant 0 : index
    %c0_2 = arith.constant 0 : index
    %2 = vector.load %arg2[%c0_1, %c0_2] : memref<16x64xbf16, #tpu.memory_space<vmem>>, vector<16x64xbf16>
    %cst = arith.constant dense<0.000000e+00> : vector<32x64xf32>
    %3 = tpu.matmul %1, %2, %cst {dimension_numbers = #tpu.dot_dimension_numbers<[1], [0], [0], [1], [0, 0, 1, 1], [], []>} : vector<32x16xbf16>, vector<16x64xbf16>, vector<32x64xf32> -> vector<32x64xf32>
    %c0_3 = arith.constant 0 : index
    %c0_4 = arith.constant 0 : index
    %4 = vector.load %arg3[%c0_3, %c0_4] : memref<1x64xf32, #tpu.memory_space<vmem>>, vector<1x64xf32>
    %5 = vector.broadcast %4 : vector<1x64xf32> to vector<32x64xf32>
    %6 = arith.addf %3, %5 : vector<32x64xf32>
    %cst_5 = arith.constant 0.000000e+00 : f32
    %7 = vector.broadcast %cst_5 : f32 to vector<32x64xf32>
    %8 = arith.maximumf %6, %7 : vector<32x64xf32>
    %9 = arith.truncf %8 : vector<32x64xf32> to vector<32x64xbf16>
    %c0_6 = arith.constant 0 : index
    %c0_7 = arith.constant 0 : index
    %10 = vector.load %arg4[%c0_6, %c0_7] : memref<64x64xbf16, #tpu.memory_space<vmem>>, vector<64x64xbf16>
    %cst_8 = arith.constant dense<0.000000e+00> : vector<32x64xf32>
    %11 = tpu.matmul %9, %10, %cst_8 {dimension_numbers = #tpu.dot_dimension_numbers<[1], [0], [0], [1], [0, 0, 1, 1], [], []>} : vector<32x64xbf16>, vector<64x64xbf16>, vector<32x64xf32> -> vector<32x64xf32>
    %c0_9 = arith.constant 0 : index
    %c0_10 = arith.constant 0 : index
    %12 = vector.load %arg5[%c0_9, %c0_10] : memref<1x64xf32, #tpu.memory_space<vmem>>, vector<1x64xf32>
    %13 = vector.broadcast %12 : vector<1x64xf32> to vector<32x64xf32>
    %14 = arith.addf %11, %13 : vector<32x64xf32>
    %cst_11 = arith.constant 0.000000e+00 : f32
    %15 = vector.broadcast %cst_11 : f32 to vector<32x64xf32>
    %16 = arith.maximumf %14, %15 : vector<32x64xf32>
    %17 = arith.truncf %16 : vector<32x64xf32> to vector<32x64xbf16>
    %c0_12 = arith.constant 0 : index
    %c0_13 = arith.constant 0 : index
    %18 = vector.load %arg6[%c0_12, %c0_13] : memref<64x32xbf16, #tpu.memory_space<vmem>>, vector<64x32xbf16>
    %cst_14 = arith.constant dense<0.000000e+00> : vector<32x32xf32>
    %19 = tpu.matmul %17, %18, %cst_14 {dimension_numbers = #tpu.dot_dimension_numbers<[1], [0], [0], [1], [0, 0, 1, 1], [], []>} : vector<32x64xbf16>, vector<64x32xbf16>, vector<32x32xf32> -> vector<32x32xf32>
    %c0_15 = arith.constant 0 : index
    %c0_16 = arith.constant 0 : index
    %20 = vector.load %arg7[%c0_15, %c0_16] : memref<1x32xf32, #tpu.memory_space<vmem>>, vector<1x32xf32>
    %21 = vector.broadcast %20 : vector<1x32xf32> to vector<32x32xf32>
    %22 = arith.addf %19, %21 : vector<32x32xf32>
    %23 = vector.extract_strided_slice %22 {offsets = [0, 0], sizes = [32, 16], strides = [1, 1]} : vector<32x32xf32> to vector<32x16xf32>
    %24 = vector.extract_strided_slice %22 {offsets = [0, 16], sizes = [32, 16], strides = [1, 1]} : vector<32x32xf32> to vector<32x16xf32>
    %25 = arith.subf %0, %23 : vector<32x16xf32>
    %cst_17 = arith.constant 0.000000e+00 : f32
    %26 = vector.broadcast %cst_17 : f32 to vector<32x16xf32>
    %27 = arith.subf %26, %24 : vector<32x16xf32>
    %28 = math.exp %27 : vector<32x16xf32>
    %29 = arith.mulf %25, %28 : vector<32x16xf32>
    %c0_18 = arith.constant 0 : index
    %c0_19 = arith.constant 0 : index
    %30 = vector.load %arg8[%c0_18, %c0_19] : memref<32x16xf32, #tpu.memory_space<vmem>>, vector<32x16xf32>
    tpu.vector_store %arg8[%c0_18, %c0_19], %29 {strides = array<i32>} : memref<32x16xf32, #tpu.memory_space<vmem>>, vector<32x16xf32>,
    %cst_20 = arith.constant dense<0.000000e+00> : vector<32xf32>
    %31 = vector.multi_reduction <add>, %24, %cst_20 [1] : vector<32x16xf32> to vector<32xf32>
    %32 = vector.shape_cast %31 : vector<32xf32> to vector<32x1xf32>
    %cst_21 = arith.constant 0.000000e+00 : f32
    %33 = vector.broadcast %cst_21 : f32 to vector<32x1xf32>
    %34 = arith.subf %33, %32 : vector<32x1xf32>
    %c0_22 = arith.constant 0 : index
    %c0_23 = arith.constant 0 : index
    %35 = vector.load %arg9[%c0_22, %c0_23] : memref<32x1xf32, #tpu.memory_space<vmem>>, vector<32x1xf32>
    tpu.vector_store %arg9[%c0_22, %c0_23], %34 {strides = array<i32>} : memref<32x1xf32, #tpu.memory_space<vmem>>, vector<32x1xf32>,
    return
  }
  func.func @transform_0(%arg0: i32) -> (i32, i32) {
    %c0_i32 = arith.constant 0 : i32
    %c0_i32_0 = arith.constant 0 : i32
    return %arg0, %c0_i32 : i32, i32
  }
  func.func @transform_1(%arg0: i32) -> (i32, i32) {
    %c0_i32 = arith.constant 0 : i32
    %c0_i32_0 = arith.constant 0 : i32
    %c0_i32_1 = arith.constant 0 : i32
    return %c0_i32, %c0_i32_0 : i32, i32
  }
  func.func @transform_2(%arg0: i32) -> (i32, i32) {
    %c0_i32 = arith.constant 0 : i32
    %c0_i32_0 = arith.constant 0 : i32
    %c0_i32_1 = arith.constant 0 : i32
    return %c0_i32, %c0_i32_0 : i32, i32
  }
  func.func @transform_3(%arg0: i32) -> (i32, i32) {
    %c0_i32 = arith.constant 0 : i32
    %c0_i32_0 = arith.constant 0 : i32
    %c0_i32_1 = arith.constant 0 : i32
    return %c0_i32, %c0_i32_0 : i32, i32
  }
  func.func @transform_4(%arg0: i32) -> (i32, i32) {
    %c0_i32 = arith.constant 0 : i32
    %c0_i32_0 = arith.constant 0 : i32
    %c0_i32_1 = arith.constant 0 : i32
    return %c0_i32, %c0_i32_0 : i32, i32
  }
  func.func @transform_5(%arg0: i32) -> (i32, i32) {
    %c0_i32 = arith.constant 0 : i32
    %c0_i32_0 = arith.constant 0 : i32
    %c0_i32_1 = arith.constant 0 : i32
    return %c0_i32, %c0_i32_0 : i32, i32
  }
  func.func @transform_6(%arg0: i32) -> (i32, i32) {
    %c0_i32 = arith.constant 0 : i32
    %c0_i32_0 = arith.constant 0 : i32
    %c0_i32_1 = arith.constant 0 : i32
    return %c0_i32, %c0_i32_0 : i32, i32
  }
  func.func @transform_7(%arg0: i32) -> (i32, i32) {
    %c0_i32 = arith.constant 0 : i32
    %c0_i32_0 = arith.constant 0 : i32
    return %arg0, %c0_i32 : i32, i32
  }
  func.func @transform_8(%arg0: i32) -> (i32, i32) {
    %c0_i32 = arith.constant 0 : i32
    %c0_i32_0 = arith.constant 0 : i32
    return %arg0, %c0_i32 : i32, i32
  }
}

module attributes {stable_mosaic.version = 11 : i64} {
  func.func @_made_direct_kernel(%arg0: i32, %arg1: memref<32x16xf32, #tpu.memory_space<vmem>>, %arg2: memref<16x64xbf16, #tpu.memory_space<vmem>>, %arg3: memref<1x64xf32, #tpu.memory_space<vmem>>, %arg4: memref<64x64xbf16, #tpu.memory_space<vmem>>, %arg5: memref<1x64xf32, #tpu.memory_space<vmem>>, %arg6: memref<64x32xbf16, #tpu.memory_space<vmem>>, %arg7: memref<1x32xf32, #tpu.memory_space<vmem>>, %arg8: memref<32x16xf32, #tpu.memory_space<vmem>>, %arg9: memref<32x1xf32, #tpu.memory_space<vmem>>) attributes {dimension_semantics = [#tpu.dimension_semantics<parallel>], iteration_bounds = array<i64: 2>, scalar_prefetch = 0 : i64, scratch_operands = 0 : i64, tpu.core_type = #tpu.core_type<tc>, window_params = [{transform_indices = @transform_0, window_bounds = array<i64: 32, 16>}, {pipeline_mode = #tpu.pipeline_mode<synchronous>, transform_indices = @transform_1, window_bounds = array<i64: 16, 64>}, {pipeline_mode = #tpu.pipeline_mode<synchronous>, transform_indices = @transform_2, window_bounds = array<i64: 1, 64>}, {pipeline_mode = #tpu.pipeline_mode<synchronous>, transform_indices = @transform_3, window_bounds = array<i64: 64, 64>}, {pipeline_mode = #tpu.pipeline_mode<synchronous>, transform_indices = @transform_4, window_bounds = array<i64: 1, 64>}, {pipeline_mode = #tpu.pipeline_mode<synchronous>, transform_indices = @transform_5, window_bounds = array<i64: 64, 32>}, {pipeline_mode = #tpu.pipeline_mode<synchronous>, transform_indices = @transform_6, window_bounds = array<i64: 1, 32>}, {transform_indices = @transform_7, window_bounds = array<i64: 32, 16>}, {transform_indices = @transform_8, window_bounds = array<i64: 32, 1>}]} {
    %c0 = arith.constant 0 : index
    %c0_0 = arith.constant 0 : index
    %0 = vector.load %arg1[%c0, %c0_0] : memref<32x16xf32, #tpu.memory_space<vmem>>, vector<32x16xf32>
    %1 = arith.truncf %0 : vector<32x16xf32> to vector<32x16xbf16>
    %c0_1 = arith.constant 0 : index
    %c0_2 = arith.constant 0 : index
    %2 = vector.load %arg2[%c0_1, %c0_2] : memref<16x64xbf16, #tpu.memory_space<vmem>>, vector<16x64xbf16>
    %cst = arith.constant dense<0.000000e+00> : vector<32x64xf32>
    %3 = tpu.matmul %1, %2, %cst {dimension_numbers = #tpu.dot_dimension_numbers<[1], [0], [0], [1], [0, 0, 1, 1], [], []>} : vector<32x16xbf16>, vector<16x64xbf16>, vector<32x64xf32> -> vector<32x64xf32>
    %c0_3 = arith.constant 0 : index
    %c0_4 = arith.constant 0 : index
    %4 = vector.load %arg3[%c0_3, %c0_4] : memref<1x64xf32, #tpu.memory_space<vmem>>, vector<1x64xf32>
    %5 = vector.broadcast %4 : vector<1x64xf32> to vector<32x64xf32>
    %6 = arith.addf %3, %5 : vector<32x64xf32>
    %cst_5 = arith.constant 0.000000e+00 : f32
    %7 = vector.broadcast %cst_5 : f32 to vector<32x64xf32>
    %8 = arith.maximumf %6, %7 : vector<32x64xf32>
    %9 = arith.truncf %8 : vector<32x64xf32> to vector<32x64xbf16>
    %c0_6 = arith.constant 0 : index
    %c0_7 = arith.constant 0 : index
    %10 = vector.load %arg4[%c0_6, %c0_7] : memref<64x64xbf16, #tpu.memory_space<vmem>>, vector<64x64xbf16>
    %cst_8 = arith.constant dense<0.000000e+00> : vector<32x64xf32>
    %11 = tpu.matmul %9, %10, %cst_8 {dimension_numbers = #tpu.dot_dimension_numbers<[1], [0], [0], [1], [0, 0, 1, 1], [], []>} : vector<32x64xbf16>, vector<64x64xbf16>, vector<32x64xf32> -> vector<32x64xf32>
    %c0_9 = arith.constant 0 : index
    %c0_10 = arith.constant 0 : index
    %12 = vector.load %arg5[%c0_9, %c0_10] : memref<1x64xf32, #tpu.memory_space<vmem>>, vector<1x64xf32>
    %13 = vector.broadcast %12 : vector<1x64xf32> to vector<32x64xf32>
    %14 = arith.addf %11, %13 : vector<32x64xf32>
    %cst_11 = arith.constant 0.000000e+00 : f32
    %15 = vector.broadcast %cst_11 : f32 to vector<32x64xf32>
    %16 = arith.maximumf %14, %15 : vector<32x64xf32>
    %17 = arith.truncf %16 : vector<32x64xf32> to vector<32x64xbf16>
    %c0_12 = arith.constant 0 : index
    %c0_13 = arith.constant 0 : index
    %18 = vector.load %arg6[%c0_12, %c0_13] : memref<64x32xbf16, #tpu.memory_space<vmem>>, vector<64x32xbf16>
    %cst_14 = arith.constant dense<0.000000e+00> : vector<32x32xf32>
    %19 = tpu.matmul %17, %18, %cst_14 {dimension_numbers = #tpu.dot_dimension_numbers<[1], [0], [0], [1], [0, 0, 1, 1], [], []>} : vector<32x64xbf16>, vector<64x32xbf16>, vector<32x32xf32> -> vector<32x32xf32>
    %c0_15 = arith.constant 0 : index
    %c0_16 = arith.constant 0 : index
    %20 = vector.load %arg7[%c0_15, %c0_16] : memref<1x32xf32, #tpu.memory_space<vmem>>, vector<1x32xf32>
    %21 = vector.broadcast %20 : vector<1x32xf32> to vector<32x32xf32>
    %22 = arith.addf %19, %21 : vector<32x32xf32>
    %23 = vector.extract_strided_slice %22 {offsets = [0, 0], sizes = [32, 16], strides = [1, 1]} : vector<32x32xf32> to vector<32x16xf32>
    %24 = vector.extract_strided_slice %22 {offsets = [0, 16], sizes = [32, 16], strides = [1, 1]} : vector<32x32xf32> to vector<32x16xf32>
    %25 = arith.subf %0, %23 : vector<32x16xf32>
    %cst_17 = arith.constant 0.000000e+00 : f32
    %26 = vector.broadcast %cst_17 : f32 to vector<32x16xf32>
    %27 = arith.subf %26, %24 : vector<32x16xf32>
    %28 = math.exp %27 : vector<32x16xf32>
    %29 = arith.mulf %25, %28 : vector<32x16xf32>
    %c0_18 = arith.constant 0 : index
    %c0_19 = arith.constant 0 : index
    %30 = vector.load %arg8[%c0_18, %c0_19] : memref<32x16xf32, #tpu.memory_space<vmem>>, vector<32x16xf32>
    tpu.vector_store %arg8[%c0_18, %c0_19], %29 {strides = array<i32>} : memref<32x16xf32, #tpu.memory_space<vmem>>, vector<32x16xf32>,
    %cst_20 = arith.constant dense<0.000000e+00> : vector<32xf32>
    %31 = vector.multi_reduction <add>, %24, %cst_20 [1] : vector<32x16xf32> to vector<32xf32>
    %32 = vector.shape_cast %31 : vector<32xf32> to vector<32x1xf32>
    %cst_21 = arith.constant 0.000000e+00 : f32
    %33 = vector.broadcast %cst_21 : f32 to vector<32x1xf32>
    %34 = arith.subf %33, %32 : vector<32x1xf32>
    %c0_22 = arith.constant 0 : index
    %c0_23 = arith.constant 0 : index
    %35 = vector.load %arg9[%c0_22, %c0_23] : memref<32x1xf32, #tpu.memory_space<vmem>>, vector<32x1xf32>
    tpu.vector_store %arg9[%c0_22, %c0_23], %34 {strides = array<i32>} : memref<32x1xf32, #tpu.memory_space<vmem>>, vector<32x1xf32>,
    return
  }
  func.func @transform_0(%arg0: i32) -> (i32, i32) {
    %c0_i32 = arith.constant 0 : i32
    %c0_i32_0 = arith.constant 0 : i32
    return %arg0, %c0_i32 : i32, i32
  }
  func.func @transform_1(%arg0: i32) -> (i32, i32) {
    %c0_i32 = arith.constant 0 : i32
    %c0_i32_0 = arith.constant 0 : i32
    %c0_i32_1 = arith.constant 0 : i32
    return %c0_i32, %c0_i32_0 : i32, i32
  }
  func.func @transform_2(%arg0: i32) -> (i32, i32) {
    %c0_i32 = arith.constant 0 : i32
    %c0_i32_0 = arith.constant 0 : i32
    %c0_i32_1 = arith.constant 0 : i32
    return %c0_i32, %c0_i32_0 : i32, i32
  }
  func.func @transform_3(%arg0: i32) -> (i32, i32) {
    %c0_i32 = arith.constant 0 : i32
    %c0_i32_0 = arith.constant 0 : i32
    %c0_i32_1 = arith.constant 0 : i32
    return %c0_i32, %c0_i32_0 : i32, i32
  }
  func.func @transform_4(%arg0: i32) -> (i32, i32) {
    %c0_i32 = arith.constant 0 : i32
    %c0_i32_0 = arith.constant 0 : i32
    %c0_i32_1 = arith.constant 0 : i32
    return %c0_i32, %c0_i32_0 : i32, i32
  }
  func.func @transform_5(%arg0: i32) -> (i32, i32) {
    %c0_i32 = arith.constant 0 : i32
    %c0_i32_0 = arith.constant 0 : i32
    %c0_i32_1 = arith.constant 0 : i32
    return %c0_i32, %c0_i32_0 : i32, i32
  }
  func.func @transform_6(%arg0: i32) -> (i32, i32) {
    %c0_i32 = arith.constant 0 : i32
    %c0_i32_0 = arith.constant 0 : i32
    %c0_i32_1 = arith.constant 0 : i32
    return %c0_i32, %c0_i32_0 : i32, i32
  }
  func.func @transform_7(%arg0: i32) -> (i32, i32) {
    %c0_i32 = arith.constant 0 : i32
    %c0_i32_0 = arith.constant 0 : i32
    return %arg0, %c0_i32 : i32, i32
  }
  func.func @transform_8(%arg0: i32) -> (i32, i32) {
    %c0_i32 = arith.constant 0 : i32
    %c0_i32_0 = arith.constant 0 : i32
    return %arg0, %c0_i32 : i32, i32
  }
}

</mosaic_0001>

<bundles_post_ra>
// kernel: tpu_custom_call.1
= control target key start
LH: loop header
LB: loop body
LE: loop exit
PB: predicated region body
PF: predicated region fallthrough
CT: control target
= control target key end

     0   :  { %s925_s27 = smov 0   ;;  %s1035_s0 = inlined_call_operand.vmem [shape: f32[64,16], index: 0, kind: input, shape index: {}]   ;;  %s1036_s1 = inlined_call_operand.vmem [shape: bf16[16,64], index: 1, kind: input, shape index: {}]   ;;  %s1037_s2 = inlined_call_operand.vmem [shape: f32[1,64], index: 2, kind: input, shape index: {}]   ;;  %s1038_s3 = inlined_call_operand.vmem [shape: bf16[64,64], index: 3, kind: input, shape index: {}]   ;;  %s1039_s4 = inlined_call_operand.vmem [shape: f32[1,64], index: 4, kind: input, shape index: {}]   ;;  %s1040_s5 = inlined_call_operand.vmem [shape: bf16[64,32], index: 5, kind: input, shape index: {}]   ;;  %s1041_s6 = inlined_call_operand.vmem [shape: f32[1,32], index: 6, kind: input, shape index: {}]   ;;  %s1042_s7 = inlined_call_operand.vmem [shape: f32[64,16], index: 7, kind: output, shape index: {0}]   ;;  %s1043_s8 = inlined_call_operand.vmem [shape: f32[64,1], index: 8, kind: output, shape index: {1}]  }
   0x1 LB: > { %s769_s28 = sadd.s32 4294967295, %s877_s27   ;;  %p773_p0 = scmp.ge.s32.totalorder %s877_s27, 1  ;;  %s877_s27 = sphi %s925_s27, %s19_s27  }
   0x2   : > { %p266_p1 = scmp.lt.s32.totalorder %s877_s27, 3 }
   0x4   : > { %p267_p2 = pnand %p773_p0, %p266_p1 }
   0x5   : > { %v854_v0 = vld [vmem:[%s1036_s1] sm:$0xff] (!%p267_p2)   ;;  %s774_s9 = sshll.u32 (!%p267_p2), %s769_s28, 2  ;;  %v856_v2 = vld [vmem:[%s1038_s3 + $0x8] sm:$0xff] (!%p267_p2)   ;;  %vm345_vm0 = vcmask (!%p267_p2), 130048   ;;  %v857_v9 = vld [vmem:[%s1038_s3 + $0x10] sm:$0xff] (!%p267_p2)   ;;  %vm446_vm1 = vcmask (!%p267_p2), 523264  }
   0x6   : > { %270 = sbr.rel (%p267_p2) target bundleno = 951 (0x3b7), region = 48  ;;  %p306_p3 = scmp.lt.s32.totalorder (!%p267_p2), %s774_s9, 7  ;;  %815 = vmatprep.subr.bf16.mxu0 (!%p267_p2), %v854_v0  ;;  %v855_v1 = vld [vmem:[%s1038_s3] sm:$0xff] (!%p267_p2)   ;;  %v858_v10 = vld [vmem:[%s1038_s3 + $0x18] sm:$0xff] (!%p267_p2)   ;;  %v860_v12 = vld [vmem:[%s1040_s5 + $0x8] sm:$0xff] (!%p267_p2)   ;;  %vm674_vm2 = vcmask (!%p267_p2), 7168  }
   0x7   : > { %816 = vmatpush3.bf16.msra.mxu0 (!%p267_p2), %v854_v0  ;;  %821 = vmatprep.subr.bf16.mxu1 (!%p267_p2), %v855_v1  ;;  %v859_v11 = vld [vmem:[%s1040_s5] sm:$0xff] (!%p267_p2)   ;;  %v861_v28 = vld [vmem:[%s1040_s5 + $0x10] sm:$0xff] (!%p267_p2)   ;;  %v862_v29 = vld [vmem:[%s1040_s5 + $0x18] sm:$0xff] (!%p267_p2)   ;;  %s879_s16 = smov (!%p267_p2), 112  }
   0x8   : > { %822 = vmatpush3.bf16.msra.mxu1 (!%p267_p2), %v855_v1  ;;  %833 = vmatprep.subr.bf16.mxu0 (!%p267_p2), %v859_v11  ;;  %v780_v13 = vld [vmem:[%s1037_s2] ss:$0 sm:$0xff] (!%p267_p2) }
   0x9   : > { %823 = vmatprep.subr.bf16.mxu1 (!%p267_p2), %v856_v2  ;;  %v784_v30 = vld [vmem:[%s1039_s4] ss:$0 sm:$0xff] (!%p267_p2) }
   0xa   : > { %v791_v45 = vld [vmem:[%s1041_s6] ss:$0 sm:$0xff] (!%p267_p2) }
   0xc   : > { %824 = vmatpush3.bf16.msra.mxu1 (!%p267_p2), %v856_v2 }
   0xd   : > { %s1045_s9 = smov (!%p306_p3, %s774_s9), 7  ;;  %825 = vmatprep.subr.bf16.mxu1 %v857_v9 }
   0xe   : > { %s942_s14 = sshll.u32 %s1045_s9, 3 }
   0xf   : > { %s309_s17 = scalar_lea.vmem %s1035_s0, %s942_s14  ;;  %s1012_s19 = scalar_lea.vmem %s1042_s7, %s942_s14 }
  0x10   : > { %v948_v3 = vld [vmem:[%s309_s17] sm:$0xff]  ;;  %v950_v4 = vld [vmem:[%s309_s17 + $0x8] sm:$0xff]  ;;  %v952_v5 = vld [vmem:[%s309_s17 + $0x10] sm:$0xff]  ;;  %826 = vmatpush3.bf16.msra.mxu1 %v857_v9  ;;  %s321_s22 = scalar_lea.vmem %s1043_s8, %s942_s14 }
  0x11   : > { %v328_v6 = vpack.c.bf16 %v950_v4, %v948_v3  ;;  %v956_v7 = vld [vmem:[%s309_s17 + $0x18] sm:$0xff]  ;;  %827 = vmatprep.subr.bf16.mxu1 %v858_v10 }
  0x12   : > { %v329_v8 = vpack.c.bf16 %v956_v7, %v952_v5 }
  0x13   : > { %817 = vmatprep.mubr.msk.bf16.mxu0 %vm345_vm0, %v328_v6 }
  0x14   : > { %818 = vmatmul.mubr.msk.bf16.vlgmr.msra.gmra.mrb[0].mxu0 %vm345_vm0, %v329_v8  ;;  %828 = vmatpush3.bf16.msra.mxu1 %v858_v10 }
  0x15   : > { %834 = vmatpush3.bf16.msra.mxu0 %v859_v11 }
  0x16   : > { %835 = vmatprep.subr.bf16.mxu0 %v860_v12 }
  0x19   : > { %836 = vmatpush3.bf16.msra.mxu0 %v860_v12 }
  0x1a   : > { %837 = vmatprep.subr.bf16.mxu0 %v861_v28 }
  0x1d   : > { %838 = vmatpush3.bf16.msra.mxu0 %v861_v28 }
  0x1e   : > { %839 = vmatprep.subr.bf16.mxu0 %v862_v29 }
  0x21   : > { %840 = vmatpush3.bf16.msra.mxu0 %v862_v29 }
  0xe7   : > { %v819_v14 = vpop.f32.mrb[0].mxu0 }
  0xe8   : > { %v395_v15 = vadd.f32 %v819_v14, %v780_v13  ;;  %v386_v16 = vpop.f32.mrb[1].mxu0 }
  0xe9   : > { %v387_v17 = vadd.f32 %v780_v13, %v386_v16  ;;  %v820_v18 = vpop.f32.mrb[2].mxu0 }
  0xea   : > { %v398_v19 = vadd.f32 %v820_v18, %v780_v13  ;;  %v389_v20 = vpop.f32.mrb[3].mxu0  ;;  %v403_v22 = vmax.f32 %v395_v15, 0.0 }
  0xeb   : > { %v390_v21 = vadd.f32 %v780_v13, %v389_v20  ;;  %v401_v24 = vmax.f32 %v387_v17, 0.0 }
  0xec   : > { %v404_v23 = vmax.f32 %v398_v19, 0.0 }
  0xed   : > { %v402_v25 = vmax.f32 %v390_v21, 0.0 }
  0xee   : > { %v406_v26 = vpack.c.bf16 %v404_v23, %v403_v22 }
  0xef   : > { %v405_v27 = vpack.c.bf16 %v402_v25, %v401_v24 }
  0xf1   : > { %829 = vmatprep.mubr.msk.bf16.mxu1 %vm446_vm1, %v405_v27 }
  0xf2   : > { %830 = vmatmul.mubr.msk.bf16.vlgmr.msra.gmra.mrb[0].mxu1 %vm446_vm1, %v406_v26 }
 0x1c5   : > { %v831_v31 = vpop.f32.mrb[0].mxu1 }
 0x1c6   : > { %v496_v32 = vadd.f32 %v831_v31, %v784_v30  ;;  %v487_v33 = vpop.f32.mrb[1].mxu1 }
 0x1c7   : > { %v488_v34 = vadd.f32 %v784_v30, %v487_v33  ;;  %v832_v35 = vpop.f32.mrb[2].mxu1 }
 0x1c8   : > { %v499_v36 = vadd.f32 %v832_v35, %v784_v30  ;;  %v490_v37 = vpop.f32.mrb[3].mxu1  ;;  %v504_v39 = vmax.f32 %v496_v32, 0.0 }
 0x1c9   : > { %v491_v38 = vadd.f32 %v784_v30, %v490_v37  ;;  %v502_v41 = vmax.f32 %v488_v34, 0.0 }
 0x1ca   : > { %v505_v40 = vmax.f32 %v499_v36, 0.0 }
 0x1cb   : > { %v503_v42 = vmax.f32 %v491_v38, 0.0 }
 0x1cc   : > { %v507_v43 = vpack.c.bf16 %v505_v40, %v504_v39 }
 0x1cd   : > { %v506_v44 = vpack.c.bf16 %v503_v42, %v502_v41 }
 0x1cf   : > { %841 = vmatprep.mubr.msk.bf16.mxu0 %vm446_vm1, %v506_v44 }
 0x1d0   : > { %842 = vmatmul.mubr.msk.bf16.vlgmr.msra.gmra.mrb[4].mxu0 %vm446_vm1, %v507_v43 }
 0x2a3   : > { %v843_v46 = vpop.f32.mrb[4].mxu0 }
 0x2a4   : > { %v993_v47 = vadd.f32 %v843_v46, %v791_v45  ;;  %v587_v48 = vpop.f32.mrb[5].mxu0 }
 0x2a5   : > { %v588_v49 = vadd.f32 %v791_v45, %v587_v48  ;;  %v844_v50 = vpop.f32.mrb[6].mxu0 }
 0x2a6   : > { %650 = vrot.lane.b32.xlu1 %v993_v47, %s879_s16  ;;  %v590_v51 = vpop.f32.mrb[7].mxu0  ;;  %v608_v52 = vsub.f32 0.0, %v993_v47  ;;  %v599_v54 = vadd.f32 %v844_v50, %v791_v45  ;;  %v604_v26 = vsub.f32 %v952_v5, %v993_v47 }
 0x2a7   : > { %v606_v53 = vsub.f32 0.0, %v588_v49  ;;  %646 = vrot.lane.b32.xlu0 %v588_v49, %s879_s16  ;;  %v591_v56 = vadd.f32 %v791_v45, %v590_v51  ;;  %v602_v11 = vsub.f32 %v948_v3, %v588_v49 }
 0x2a8   : > { %v614_v57 = vmul.f32 1.442695, %v608_v52  ;;  %v609_v63 = vsub.f32 0.0, %v599_v54  ;;  %v605_v29 = vsub.f32 %v956_v7, %v599_v54 }
 0x2a9   : > { %v610_v55 = vmul.f32 1.442695, %v606_v53  ;;  %v607_v10 = vsub.f32 0.0, %v591_v56  ;;  %v603_v25 = vsub.f32 %v950_v4, %v591_v56 }
 0x2aa   : > { %652 = vrot.lane.b32.xlu1 %v599_v54, %s879_s16  ;;  %v616_v8 = vmul.f32 1.442695, %v609_v63 }
 0x2ab   : > { %863 = vpow2.f32 %v610_v55  ;;  %648 = vrot.lane.b32.xlu0 %v591_v56, %s879_s16  ;;  %v612_v13 = vmul.f32 1.442695, %v607_v10 }
 0x2ac   : > { %865 = vpow2.f32 %v614_v57 }
 0x2ad   : > { %867 = vpow2.f32 %v616_v8 }
 0x2ae   : > { %869 = vpow2.f32 %v612_v13 }
 0x2b5   : > { %v864_v58 = vpop.eup %863 }
 0x2b6   : > { %622 = vrot.lane.b32.xlu1 %v864_v58, %s879_s16  ;;  %v866_v59 = vpop.eup %865 }
 0x2b7   : > { %v868_v15 = vpop.eup %867 }
 0x2b8   : > { %v870_v16 = vpop.eup %869 }
 0x2ba   : > { %626 = vrot.lane.b32.xlu1 %v866_v59, %s879_s16 }
 0x318   : > { %v651_v60 = vpop.permute.xlu1 %650 }
 0x319   : > { %v647_v61 = vpop.permute.xlu0 %646  ;;  %v664_v62 = vsel %vm345_vm0, %v651_v60, 0.0 }
 0x31a   : > { %665 = vadd.xlane.f32.xlu0 %v664_v62  ;;  %v658_v1 = vsel %vm345_vm0, %v647_v61, 0.0 }
 0x31c   : > { %v653_v2 = vpop.permute.xlu1 %652 }
 0x31d   : > { %v649_v0 = vpop.permute.xlu0 %648  ;;  %v667_v9 = vsel %vm345_vm0, %v653_v2, 0.0 }
 0x31e   : > { %659 = vadd.xlane.f32.xlu0 %v658_v1  ;;  %v661_v6 = vsel %vm345_vm0, %v649_v0, 0.0 }
 0x31f   : > { %662 = vadd.xlane.f32.xlu1 %v661_v6 }
 0x322   : > { %668 = vadd.xlane.f32.xlu0 %v667_v9 }
 0x328   : > { %v623_v12 = vpop.permute.xlu1 %622 }
 0x329   : > { %v634_v14 = vmul.f32 %v623_v12, %v602_v11 }
 0x32b   : > { %638 = vst.msk [vmem:[%s1012_s19] sm:$0xff] %vm345_vm0, %v634_v14 }
 0x32c   : > { %v627_v3 = vpop.permute.xlu1 %626 }
 0x32d   : > { %v636_v31 = vmul.f32 %v627_v3, %v604_v26 }
 0x32f   : > { %640 = vst.msk [vmem:[%s1012_s19 + $0x10] sm:$0xff] %vm345_vm0, %v636_v31 }
 0x330   : > { %628 = vrot.lane.b32.xlu1 %v868_v15, %s879_s16 }
 0x338   : > { %624 = vrot.lane.b32.xlu0 %v870_v16, %s879_s16 }
 0x3a7   : > { %v666_v17 = vpop.xlane.xlu0 %665 }
 0x3a8   : > { %v672_v22 = vsub.f32 0.0, %v666_v17 }
 0x3aa   : > { %677 = vst.msk [vmem:[%s321_s22 + $0x10] sm:$0xff] %vm674_vm2, %v672_v22 }
 0x3ab   : > { %v660_v18 = vpop.xlane.xlu0 %659 }
 0x3ac   : > { %v670_v19 = vsub.f32 0.0, %v660_v18  ;;  %v663_v20 = vpop.xlane.xlu1 %662 }
 0x3ad   : > { %v671_v21 = vsub.f32 0.0, %v663_v20 }
 0x3ae   : > { %675 = vst.msk [vmem:[%s321_s22] sm:$0xff] %vm674_vm2, %v670_v19 }
 0x3af   : > { %676 = vst.msk [vmem:[%s321_s22 + $0x8] sm:$0xff] %vm674_vm2, %v671_v21  ;;  %v669_v23 = vpop.xlane.xlu0 %668 }
 0x3b0   : > { %v673_v24 = vsub.f32 0.0, %v669_v23  ;;  %v629_v27 = vpop.permute.xlu1 %628 }
 0x3b1   : > { %v637_v32 = vmul.f32 %v629_v27, %v605_v29 }
 0x3b2   : > { %678 = vst.msk [vmem:[%s321_s22 + $0x18] sm:$0xff] %vm674_vm2, %v673_v24 }
 0x3b3   : > { %v625_v28 = vpop.permute.xlu0 %624  ;;  %641 = vst.msk [vmem:[%s1012_s19 + $0x18] sm:$0xff] %vm345_vm0, %v637_v32 }
 0x3b4   : > { %v635_v30 = vmul.f32 %v625_v28, %v603_v25 }
 0x3b6   : > { %639 = vst.msk [vmem:[%s1012_s19 + $0x8] sm:$0xff] %vm345_vm0, %v635_v30 }
 0x3b7 PF: > { %s19_s27 = sadd.s32 1, %s877_s27  }
 0x3b8   : > { %p16_p4 = scmp.ge.s32.totalorder %s19_s27, 4  }
 0x3ba   :  { %18 = sbr.rel (!%p16_p4) target bundleno = 1 (0x1), region = 90 }

// kernel: tpu_custom_call.1
= control target key start
LH: loop header
LB: loop body
LE: loop exit
PB: predicated region body
PF: predicated region fallthrough
CT: control target
= control target key end

     0   :  { %s925_s27 = smov 0   ;;  %s1035_s0 = inlined_call_operand.vmem [shape: f32[64,16], index: 0, kind: input, shape index: {}]   ;;  %s1036_s1 = inlined_call_operand.vmem [shape: bf16[16,64], index: 1, kind: input, shape index: {}]   ;;  %s1037_s2 = inlined_call_operand.vmem [shape: f32[1,64], index: 2, kind: input, shape index: {}]   ;;  %s1038_s3 = inlined_call_operand.vmem [shape: bf16[64,64], index: 3, kind: input, shape index: {}]   ;;  %s1039_s4 = inlined_call_operand.vmem [shape: f32[1,64], index: 4, kind: input, shape index: {}]   ;;  %s1040_s5 = inlined_call_operand.vmem [shape: bf16[64,32], index: 5, kind: input, shape index: {}]   ;;  %s1041_s6 = inlined_call_operand.vmem [shape: f32[1,32], index: 6, kind: input, shape index: {}]   ;;  %s1042_s7 = inlined_call_operand.vmem [shape: f32[64,16], index: 7, kind: output, shape index: {0}]   ;;  %s1043_s8 = inlined_call_operand.vmem [shape: f32[64,1], index: 8, kind: output, shape index: {1}]  }
   0x1 LB: > { %s769_s28 = sadd.s32 4294967295, %s877_s27   ;;  %p773_p0 = scmp.ge.s32.totalorder %s877_s27, 1  ;;  %s877_s27 = sphi %s925_s27, %s19_s27  }
   0x2   : > { %p266_p1 = scmp.lt.s32.totalorder %s877_s27, 3 }
   0x4   : > { %p267_p2 = pnand %p773_p0, %p266_p1 }
   0x5   : > { %v854_v0 = vld [vmem:[%s1036_s1] sm:$0xff] (!%p267_p2)   ;;  %s774_s9 = sshll.u32 (!%p267_p2), %s769_s28, 2  ;;  %v856_v2 = vld [vmem:[%s1038_s3 + $0x8] sm:$0xff] (!%p267_p2)   ;;  %vm345_vm0 = vcmask (!%p267_p2), 130048   ;;  %v857_v9 = vld [vmem:[%s1038_s3 + $0x10] sm:$0xff] (!%p267_p2)   ;;  %vm446_vm1 = vcmask (!%p267_p2), 523264  }
   0x6   : > { %270 = sbr.rel (%p267_p2) target bundleno = 951 (0x3b7), region = 48  ;;  %p306_p3 = scmp.lt.s32.totalorder (!%p267_p2), %s774_s9, 7  ;;  %815 = vmatprep.subr.bf16.mxu0 (!%p267_p2), %v854_v0  ;;  %v855_v1 = vld [vmem:[%s1038_s3] sm:$0xff] (!%p267_p2)   ;;  %v858_v10 = vld [vmem:[%s1038_s3 + $0x18] sm:$0xff] (!%p267_p2)   ;;  %v860_v12 = vld [vmem:[%s1040_s5 + $0x8] sm:$0xff] (!%p267_p2)   ;;  %vm674_vm2 = vcmask (!%p267_p2), 7168  }
   0x7   : > { %816 = vmatpush3.bf16.msra.mxu0 (!%p267_p2), %v854_v0  ;;  %821 = vmatprep.subr.bf16.mxu1 (!%p267_p2), %v855_v1  ;;  %v859_v11 = vld [vmem:[%s1040_s5] sm:$0xff] (!%p267_p2)   ;;  %v861_v28 = vld [vmem:[%s1040_s5 + $0x10] sm:$0xff] (!%p267_p2)   ;;  %v862_v29 = vld [vmem:[%s1040_s5 + $0x18] sm:$0xff] (!%p267_p2)   ;;  %s879_s16 = smov (!%p267_p2), 112  }
   0x8   : > { %822 = vmatpush3.bf16.msra.mxu1 (!%p267_p2), %v855_v1  ;;  %833 = vmatprep.subr.bf16.mxu0 (!%p267_p2), %v859_v11  ;;  %v780_v13 = vld [vmem:[%s1037_s2] ss:$0 sm:$0xff] (!%p267_p2) }
   0x9   : > { %823 = vmatprep.subr.bf16.mxu1 (!%p267_p2), %v856_v2  ;;  %v784_v30 = vld [vmem:[%s1039_s4] ss:$0 sm:$0xff] (!%p267_p2) }
   0xa   : > { %v791_v45 = vld [vmem:[%s1041_s6] ss:$0 sm:$0xff] (!%p267_p2) }
   0xc   : > { %824 = vmatpush3.bf16.msra.mxu1 (!%p267_p2), %v856_v2 }
   0xd   : > { %s1045_s9 = smov (!%p306_p3, %s774_s9), 7  ;;  %825 = vmatprep.subr.bf16.mxu1 %v857_v9 }
   0xe   : > { %s942_s14 = sshll.u32 %s1045_s9, 3 }
   0xf   : > { %s309_s17 = scalar_lea.vmem %s1035_s0, %s942_s14  ;;  %s1012_s19 = scalar_lea.vmem %s1042_s7, %s942_s14 }
  0x10   : > { %v948_v3 = vld [vmem:[%s309_s17] sm:$0xff]  ;;  %v950_v4 = vld [vmem:[%s309_s17 + $0x8] sm:$0xff]  ;;  %v952_v5 = vld [vmem:[%s309_s17 + $0x10] sm:$0xff]  ;;  %826 = vmatpush3.bf16.msra.mxu1 %v857_v9  ;;  %s321_s22 = scalar_lea.vmem %s1043_s8, %s942_s14 }
  0x11   : > { %v328_v6 = vpack.c.bf16 %v950_v4, %v948_v3  ;;  %v956_v7 = vld [vmem:[%s309_s17 + $0x18] sm:$0xff]  ;;  %827 = vmatprep.subr.bf16.mxu1 %v858_v10 }
  0x12   : > { %v329_v8 = vpack.c.bf16 %v956_v7, %v952_v5 }
  0x13   : > { %817 = vmatprep.mubr.msk.bf16.mxu0 %vm345_vm0, %v328_v6 }
  0x14   : > { %818 = vmatmul.mubr.msk.bf16.vlgmr.msra.gmra.mrb[0].mxu0 %vm345_vm0, %v329_v8  ;;  %828 = vmatpush3.bf16.msra.mxu1 %v858_v10 }
  0x15   : > { %834 = vmatpush3.bf16.msra.mxu0 %v859_v11 }
  0x16   : > { %835 = vmatprep.subr.bf16.mxu0 %v860_v12 }
  0x19   : > { %836 = vmatpush3.bf16.msra.mxu0 %v860_v12 }
  0x1a   : > { %837 = vmatprep.subr.bf16.mxu0 %v861_v28 }
  0x1d   : > { %838 = vmatpush3.bf16.msra.mxu0 %v861_v28 }
  0x1e   : > { %839 = vmatprep.subr.bf16.mxu0 %v862_v29 }
  0x21   : > { %840 = vmatpush3.bf16.msra.mxu0 %v862_v29 }
  0xe7   : > { %v819_v14 = vpop.f32.mrb[0].mxu0 }
  0xe8   : > { %v395_v15 = vadd.f32 %v819_v14, %v780_v13  ;;  %v386_v16 = vpop.f32.mrb[1].mxu0 }
  0xe9   : > { %v387_v17 = vadd.f32 %v780_v13, %v386_v16  ;;  %v820_v18 = vpop.f32.mrb[2].mxu0 }
  0xea   : > { %v398_v19 = vadd.f32 %v820_v18, %v780_v13  ;;  %v389_v20 = vpop.f32.mrb[3].mxu0  ;;  %v403_v22 = vmax.f32 %v395_v15, 0.0 }
  0xeb   : > { %v390_v21 = vadd.f32 %v780_v13, %v389_v20  ;;  %v401_v24 = vmax.f32 %v387_v17, 0.0 }
  0xec   : > { %v404_v23 = vmax.f32 %v398_v19, 0.0 }
  0xed   : > { %v402_v25 = vmax.f32 %v390_v21, 0.0 }
  0xee   : > { %v406_v26 = vpack.c.bf16 %v404_v23, %v403_v22 }
  0xef   : > { %v405_v27 = vpack.c.bf16 %v402_v25, %v401_v24 }
  0xf1   : > { %829 = vmatprep.mubr.msk.bf16.mxu1 %vm446_vm1, %v405_v27 }
  0xf2   : > { %830 = vmatmul.mubr.msk.bf16.vlgmr.msra.gmra.mrb[0].mxu1 %vm446_vm1, %v406_v26 }
 0x1c5   : > { %v831_v31 = vpop.f32.mrb[0].mxu1 }
 0x1c6   : > { %v496_v32 = vadd.f32 %v831_v31, %v784_v30  ;;  %v487_v33 = vpop.f32.mrb[1].mxu1 }
 0x1c7   : > { %v488_v34 = vadd.f32 %v784_v30, %v487_v33  ;;  %v832_v35 = vpop.f32.mrb[2].mxu1 }
 0x1c8   : > { %v499_v36 = vadd.f32 %v832_v35, %v784_v30  ;;  %v490_v37 = vpop.f32.mrb[3].mxu1  ;;  %v504_v39 = vmax.f32 %v496_v32, 0.0 }
 0x1c9   : > { %v491_v38 = vadd.f32 %v784_v30, %v490_v37  ;;  %v502_v41 = vmax.f32 %v488_v34, 0.0 }
 0x1ca   : > { %v505_v40 = vmax.f32 %v499_v36, 0.0 }
 0x1cb   : > { %v503_v42 = vmax.f32 %v491_v38, 0.0 }
 0x1cc   : > { %v507_v43 = vpack.c.bf16 %v505_v40, %v504_v39 }
 0x1cd   : > { %v506_v44 = vpack.c.bf16 %v503_v42, %v502_v41 }
 0x1cf   : > { %841 = vmatprep.mubr.msk.bf16.mxu0 %vm446_vm1, %v506_v44 }
 0x1d0   : > { %842 = vmatmul.mubr.msk.bf16.vlgmr.msra.gmra.mrb[4].mxu0 %vm446_vm1, %v507_v43 }
 0x2a3   : > { %v843_v46 = vpop.f32.mrb[4].mxu0 }
 0x2a4   : > { %v993_v47 = vadd.f32 %v843_v46, %v791_v45  ;;  %v587_v48 = vpop.f32.mrb[5].mxu0 }
 0x2a5   : > { %v588_v49 = vadd.f32 %v791_v45, %v587_v48  ;;  %v844_v50 = vpop.f32.mrb[6].mxu0 }
 0x2a6   : > { %650 = vrot.lane.b32.xlu1 %v993_v47, %s879_s16  ;;  %v590_v51 = vpop.f32.mrb[7].mxu0  ;;  %v608_v52 = vsub.f32 0.0, %v993_v47  ;;  %v599_v54 = vadd.f32 %v844_v50, %v791_v45  ;;  %v604_v26 = vsub.f32 %v952_v5, %v993_v47 }
 0x2a7   : > { %v606_v53 = vsub.f32 0.0, %v588_v49  ;;  %646 = vrot.lane.b32.xlu0 %v588_v49, %s879_s16  ;;  %v591_v56 = vadd.f32 %v791_v45, %v590_v51  ;;  %v602_v11 = vsub.f32 %v948_v3, %v588_v49 }
 0x2a8   : > { %v614_v57 = vmul.f32 1.442695, %v608_v52  ;;  %v609_v63 = vsub.f32 0.0, %v599_v54  ;;  %v605_v29 = vsub.f32 %v956_v7, %v599_v54 }
 0x2a9   : > { %v610_v55 = vmul.f32 1.442695, %v606_v53  ;;  %v607_v10 = vsub.f32 0.0, %v591_v56  ;;  %v603_v25 = vsub.f32 %v950_v4, %v591_v56 }
 0x2aa   : > { %652 = vrot.lane.b32.xlu1 %v599_v54, %s879_s16  ;;  %v616_v8 = vmul.f32 1.442695, %v609_v63 }
 0x2ab   : > { %863 = vpow2.f32 %v610_v55  ;;  %648 = vrot.lane.b32.xlu0 %v591_v56, %s879_s16  ;;  %v612_v13 = vmul.f32 1.442695, %v607_v10 }
 0x2ac   : > { %865 = vpow2.f32 %v614_v57 }
 0x2ad   : > { %867 = vpow2.f32 %v616_v8 }
 0x2ae   : > { %869 = vpow2.f32 %v612_v13 }
 0x2b5   : > { %v864_v58 = vpop.eup %863 }
 0x2b6   : > { %622 = vrot.lane.b32.xlu1 %v864_v58, %s879_s16  ;;  %v866_v59 = vpop.eup %865 }
 0x2b7   : > { %v868_v15 = vpop.eup %867 }
 0x2b8   : > { %v870_v16 = vpop.eup %869 }
 0x2ba   : > { %626 = vrot.lane.b32.xlu1 %v866_v59, %s879_s16 }
 0x318   : > { %v651_v60 = vpop.permute.xlu1 %650 }
 0x319   : > { %v647_v61 = vpop.permute.xlu0 %646  ;;  %v664_v62 = vsel %vm345_vm0, %v651_v60, 0.0 }
 0x31a   : > { %665 = vadd.xlane.f32.xlu0 %v664_v62  ;;  %v658_v1 = vsel %vm345_vm0, %v647_v61, 0.0 }
 0x31c   : > { %v653_v2 = vpop.permute.xlu1 %652 }
 0x31d   : > { %v649_v0 = vpop.permute.xlu0 %648  ;;  %v667_v9 = vsel %vm345_vm0, %v653_v2, 0.0 }
 0x31e   : > { %659 = vadd.xlane.f32.xlu0 %v658_v1  ;;  %v661_v6 = vsel %vm345_vm0, %v649_v0, 0.0 }
 0x31f   : > { %662 = vadd.xlane.f32.xlu1 %v661_v6 }
 0x322   : > { %668 = vadd.xlane.f32.xlu0 %v667_v9 }
 0x328   : > { %v623_v12 = vpop.permute.xlu1 %622 }
 0x329   : > { %v634_v14 = vmul.f32 %v623_v12, %v602_v11 }
 0x32b   : > { %638 = vst.msk [vmem:[%s1012_s19] sm:$0xff] %vm345_vm0, %v634_v14 }
 0x32c   : > { %v627_v3 = vpop.permute.xlu1 %626 }
 0x32d   : > { %v636_v31 = vmul.f32 %v627_v3, %v604_v26 }
 0x32f   : > { %640 = vst.msk [vmem:[%s1012_s19 + $0x10] sm:$0xff] %vm345_vm0, %v636_v31 }
 0x330   : > { %628 = vrot.lane.b32.xlu1 %v868_v15, %s879_s16 }
 0x338   : > { %624 = vrot.lane.b32.xlu0 %v870_v16, %s879_s16 }
 0x3a7   : > { %v666_v17 = vpop.xlane.xlu0 %665 }
 0x3a8   : > { %v672_v22 = vsub.f32 0.0, %v666_v17 }
 0x3aa   : > { %677 = vst.msk [vmem:[%s321_s22 + $0x10] sm:$0xff] %vm674_vm2, %v672_v22 }
 0x3ab   : > { %v660_v18 = vpop.xlane.xlu0 %659 }
 0x3ac   : > { %v670_v19 = vsub.f32 0.0, %v660_v18  ;;  %v663_v20 = vpop.xlane.xlu1 %662 }
 0x3ad   : > { %v671_v21 = vsub.f32 0.0, %v663_v20 }
 0x3ae   : > { %675 = vst.msk [vmem:[%s321_s22] sm:$0xff] %vm674_vm2, %v670_v19 }
 0x3af   : > { %676 = vst.msk [vmem:[%s321_s22 + $0x8] sm:$0xff] %vm674_vm2, %v671_v21  ;;  %v669_v23 = vpop.xlane.xlu0 %668 }
 0x3b0   : > { %v673_v24 = vsub.f32 0.0, %v669_v23  ;;  %v629_v27 = vpop.permute.xlu1 %628 }
 0x3b1   : > { %v637_v32 = vmul.f32 %v629_v27, %v605_v29 }
 0x3b2   : > { %678 = vst.msk [vmem:[%s321_s22 + $0x18] sm:$0xff] %vm674_vm2, %v673_v24 }
 0x3b3   : > { %v625_v28 = vpop.permute.xlu0 %624  ;;  %641 = vst.msk [vmem:[%s1012_s19 + $0x18] sm:$0xff] %vm345_vm0, %v637_v32 }
 0x3b4   : > { %v635_v30 = vmul.f32 %v625_v28, %v603_v25 }
 0x3b6   : > { %639 = vst.msk [vmem:[%s1012_s19 + $0x8] sm:$0xff] %vm345_vm0, %v635_v30 }
 0x3b7 PF: > { %s19_s27 = sadd.s32 1, %s877_s27  }
 0x3b8   : > { %p16_p4 = scmp.ge.s32.totalorder %s19_s27, 4  }
 0x3ba   :  { %18 = sbr.rel (!%p16_p4) target bundleno = 1 (0x1), region = 90 }

</bundles_post_ra>
